<compile_context>
chip_gen: v7x
topology: tpu7x:2x2x1
jax: 0.10.0
libtpu: 0.0.40
codegen_flags: <defaults>
</compile_context>

<pallas_src>
import functools

import jax
import jax.numpy as jnp
from jax.experimental import pallas as pl
from jax.experimental.pallas import tpu as pltpu

_NUM_CORE_SPLITS = 2            # leading "parallel" axis for the absmax pass (v7x dual-TC)


def _cdiv(a, b):
    return -(-a // b)


def _vmem_capacity_bytes():
    """Per-core VMEM capacity; conservative fallback if the query is unavailable."""
    try:
        info = pltpu.get_tpu_info()
        cap = getattr(info, "vmem_capacity_bytes", None)
        if cap:
            return int(cap)
    except Exception:
        pass
    return 64 * 1024 * 1024      # v7x per-TC VMEM (smallest across generations)


def _choose_width(n):
    """Widest lane count in {1024,512,256,128} dividing n (no padding copy needed)."""
    for w in (1024, 512, 256, 128):
        if n % w == 0:
            return w, 0
    return 128, (-n) % 128       # rare fallback: tiny pad to a multiple of 128


# ----------------------------- kernels ------------------------------------ #

def _fused_kernel(x_ref, o_ref, *, half_level, isint):
    """Single pass: global absmax + quantize, whole slab resident in VMEM."""
    x = x_ref[...].astype(jnp.float32)
    scale = jnp.max(jnp.abs(x))
    safe = jnp.where(scale == 0.0, 1.0, scale)
    q = jnp.round(x * (half_level / safe))          # scalar mult hoisted
    if isint == 0:
        q = q * (safe / half_level)                 # scalar mult hoisted
    o_ref[...] = jnp.where(scale == 0.0, x, q).astype(o_ref.dtype)


def _absmax_kernel(x_ref, o_ref, m_scratch, *, tile_rows, inner_tiles,
                   row_tiles, rows_valid):
    """Per-core running elementwise max (VPU); one XLU reduce at the last step.

    grid = (cores, inner_tiles); the inner "arbitrary" axis sweeps this core's
    share of the row tiles.  Out-of-range tiles are clamped to the last real
    tile (harmless duplicate for a max) and ragged tail rows are masked to 0.
    """
    c = pl.program_id(0)
    i = pl.program_id(1)

    @pl.when(i == 0)
    def _():
        m_scratch[...] = jnp.zeros_like(m_scratch)

    blk = jnp.minimum(c * inner_tiles + i, row_tiles - 1)
    row0 = blk * tile_rows
    xf = jnp.abs(x_ref[...].astype(jnp.float32))
    row_idx = row0 + jax.lax.broadcasted_iota(jnp.int32, xf.shape, 0)
    xf = jnp.where(row_idx < rows_valid, xf, 0.0)   # mask ragged/garbage rows
    m_scratch[...] = jnp.maximum(m_scratch[...], xf)

    @pl.when(i == pl.num_programs(1) - 1)
    def _():
        o_ref[...] = jnp.full(o_ref.shape, jnp.max(m_scratch[...]), jnp.float32)


def _quant_kernel(scale_ref, x_ref, o_ref, *, half_level, isint):
    """Elementwise symmetric quantization; scale arrives as an SMEM scalar."""
    scale = scale_ref[0]
    x = x_ref[...].astype(jnp.float32)
    safe = jnp.where(scale == 0.0, 1.0, scale)
    q = jnp.round(x * (half_level / safe))          # scalar mult hoisted
    if isint == 0:
        q = q * (safe / half_level)                 # scalar mult hoisted
    o_ref[...] = jnp.where(scale == 0.0, x, q).astype(o_ref.dtype)


# ----------------------------- wrapper ------------------------------------ #

class LayerQuantPallas:
    def __init__(self, bit_level, isint, clamp_std, *,
                 tile_target_bytes=2 * 1024 * 1024, fuse_limit_bytes=None):
        self.isint = int(isint)
        self.output_half_level = 2 ** bit_level / 2 - 1
        # clamp_std is stored but never used in Layer_Quant.forward (matches PyTorch).
        self.clamp_std = clamp_std
        self.tile_target_bytes = tile_target_bytes   # ~f32 bytes per tile (two-pass path)
        self.fuse_limit_bytes = fuse_limit_bytes     # None -> generation-aware auto

    def __call__(self, x):
        if self.output_half_level <= 0:
            return x                                 # matches data_quantization_sym
        half_level = self.output_half_level + 0.4999  # boundary_refine

        orig_shape, orig_dtype = x.shape, x.dtype
        n_total = x.size
        if n_total == 0:
            return x

        vmem_cap = _vmem_capacity_bytes()

        # Lane-dense 2D slab; padding (and its full-array copy) only when the
        # element count is not a multiple of 128.  Zero padding never raises
        # the absmax; the padded tail is sliced off at the end.
        flat = x.reshape(-1)
        width, pad = _choose_width(n_total)
        if pad:
            flat = jnp.concatenate([flat, jnp.zeros((pad,), dtype=flat.dtype)])
        rows = flat.size // width
        x2d = flat.reshape(rows, width)

        # Fused single-launch path: 2N HBM bytes instead of 3N.  VMEM footprint
        # ~= in + out (orig dtype) + ~3x f32 temporaries (materialized f32 cast
        # feeds both the reduce and the quantize).
        footprint = n_total * (2 * jnp.dtype(orig_dtype).itemsize + 3 * 4)
        if self.fuse_limit_bytes is None:
            fuse = footprint <= int(0.6 * vmem_cap)
        else:
            fuse = footprint <= self.fuse_limit_bytes
        if rows < 8:
            fuse = True    # too small to tile; always fits fused

        if fuse:
            y2d = pl.pallas_call(
                functools.partial(_fused_kernel,
                                  half_level=half_level, isint=self.isint),
                out_shape=jax.ShapeDtypeStruct((rows, width), orig_dtype),
                compiler_params=pltpu.CompilerParams(
                    vmem_limit_bytes=int(0.85 * vmem_cap)),
            )(x2d)
        else:
            # ---- two-pass path: absmax sweep then elementwise quantize ----
            target_rows = max(8, ((self.tile_target_bytes // 4) // width) // 8 * 8)
            max_tile_rows = (rows // 8) * 8
            tile_rows = min(target_rows, max_tile_rows)
            row_tiles = _cdiv(rows, tile_rows)
            inner_tiles = _cdiv(row_tiles, _NUM_CORE_SPLITS)
            grid_vmem = min(48 * 1024 * 1024, int(0.75 * vmem_cap))

            # Pass 1: global abs-max, sharded across TensorCores on the leading
            # "parallel" axis; each core emits one (8,128) slab filled with its
            # partial maximum.
            partials = pl.pallas_call(
                functools.partial(_absmax_kernel, tile_rows=tile_rows,
                                  inner_tiles=inner_tiles, row_tiles=row_tiles,
                                  rows_valid=rows),
                out_shape=jax.ShapeDtypeStruct((_NUM_CORE_SPLITS, 8, 128),
                                               jnp.float32),
                grid=(_NUM_CORE_SPLITS, inner_tiles),
                in_specs=[pl.BlockSpec(
                    (tile_rows, width),
                    lambda c, i: (jnp.minimum(c * inner_tiles + i,
                                              row_tiles - 1), 0))],
                out_specs=pl.BlockSpec((1, 8, 128), lambda c, i: (c, 0, 0)),
                scratch_shapes=[pltpu.VMEM((tile_rows, width), jnp.float32)],
                compiler_params=pltpu.CompilerParams(
                    dimension_semantics=("parallel", "arbitrary"),
                    vmem_limit_bytes=grid_vmem),
            )(x2d)
            scale = jnp.max(partials).reshape(1)

            # Pass 2: elementwise quantization; scale goes through SMEM, grid
            # axis is fully independent -> "parallel".
            y2d = pl.pallas_call(
                functools.partial(_quant_kernel,
                                  half_level=half_level, isint=self.isint),
                out_shape=jax.ShapeDtypeStruct((rows, width), orig_dtype),
                grid=(row_tiles,),
                in_specs=[
                    pl.BlockSpec(memory_space=pltpu.MemorySpace.SMEM),
                    pl.BlockSpec((tile_rows, width), lambda i: (i, 0)),
                ],
                out_specs=pl.BlockSpec((tile_rows, width), lambda i: (i, 0)),
                compiler_params=pltpu.CompilerParams(
                    dimension_semantics=("parallel",),
                    vmem_limit_bytes=grid_vmem),
            )(scale, x2d)

        if pad:
            return y2d.reshape(-1)[:n_total].reshape(orig_shape)
        return y2d.reshape(orig_shape)


# ----------------------------- reference ---------------------------------- #

def _reference(x, bit_level, isint):
    # Mirrors data_quantization_sym defaults (boundary_refine=True, clamp_std=0,
    # scale=None -> max|x|, reg_shift_mode=False), with the same scalar-hoisted
    # ordering as the kernels (differs from the literal torch expression by at
    # most ~1 ulp before rounding).
    half_level = 2 ** bit_level / 2 - 1
    if half_level <= 0:
        return x
    half_level += 0.4999
    scale = jnp.max(jnp.abs(x))
    safe = jnp.where(scale == 0.0, 1.0, scale)
    q = jnp.round(x * (half_level / safe))
    if isint == 0:
        q = q * (safe / half_level)
    return jnp.where(scale == 0.0, x, q)


# ------------------------------- main -------------------------------------- #

if __name__ == "__main__":
    key = jax.random.PRNGKey(0)
    k1, k2 = jax.random.split(key)

    # Small NCHW input -> fused single-launch path.
    x = jax.random.normal(k1, (2, 4, 16, 16), dtype=jnp.float32)
    y_ref = _reference(x, bit_level=4, isint=0)
    layer = LayerQuantPallas(bit_level=4, isint=0, clamp_std=0)
    y = jax.block_until_ready(layer(x))
    assert y.shape == x.shape and y.dtype == x.dtype
    assert jnp.allclose(y, y_ref, atol=1e-5, rtol=1e-5), "fused mismatch vs reference"

    # Two-pass tiled path (used for large inputs), exercised on a modest input
    # by disabling fusion and shrinking the tile target.  20 rows of width 1024
    # with 8-row tiles -> 3 row tiles, ragged last tile, 2-way core split.
    x2 = jax.random.normal(k2, (2, 10, 32, 32), dtype=jnp.float32)
    y2_ref = _reference(x2, bit_level=4, isint=0)
    layer_tiled = LayerQuantPallas(bit_level=4, isint=0, clamp_std=0,
                                   fuse_limit_bytes=0,
                                   tile_target_bytes=32 * 1024)
    y2 = jax.block_until_ready(layer_tiled(x2))
    assert y2.shape == x2.shape and y2.dtype == x2.dtype
    assert jnp.allclose(y2, y2_ref, atol=1e-5, rtol=1e-5), "tiled mismatch vs reference"

    # Integer-code path (isint=1).
    layer_int = LayerQuantPallas(bit_level=4, isint=1, clamp_std=0)
    y3 = jax.block_until_ready(layer_int(x))
    assert jnp.allclose(y3, _reference(x, bit_level=4, isint=1),
                        atol=1e-5, rtol=1e-5), "isint mismatch vs reference"

    print("KERNEL_OK")
</pallas_src>

<mosaic_0001>
module attributes {stable_mosaic.version = 11 : i64} {
  func.func @_fused_kernel(%arg0: memref<2x1024xf32, #tpu.memory_space<vmem>>, %arg1: memref<2x1024xf32, #tpu.memory_space<vmem>>) attributes {dimension_semantics = [], scalar_prefetch = 0 : i64, scratch_operands = 0 : i64, tpu.core_type = #tpu.core_type<tc>} {
    %c0 = arith.constant 0 : index
    %c0_0 = arith.constant 0 : index
    %0 = vector.load %arg0[%c0, %c0_0] : memref<2x1024xf32, #tpu.memory_space<vmem>>, vector<2x1024xf32>
    %1 = math.absf %0 : vector<2x1024xf32>
    %2 = vector.shape_cast %1 : vector<2x1024xf32> to vector<1x2x1024xf32>
    %cst = arith.constant dense<0xFF800000> : vector<1xf32>
    %3 = vector.multi_reduction <maximumf>, %2, %cst [1, 2] : vector<1x2x1024xf32> to vector<1xf32>
    %4 = vector.shape_cast %3 : vector<1xf32> to vector<1x1x1xf32>
    %5 = vector.extract %4[0, 0, 0] : f32 from vector<1x1x1xf32>
    %cst_1 = arith.constant 0.000000e+00 : f32
    %6 = arith.cmpf oeq, %5, %cst_1 : f32
    %cst_2 = arith.constant 1.000000e+00 : f32
    %7 = arith.select %6, %cst_2, %5 : f32
    %cst_3 = arith.constant 7.49989986 : f32
    %8 = arith.divf %cst_3, %7 : f32
    %9 = vector.broadcast %8 : f32 to vector<2x1024xf32>
    %10 = arith.mulf %0, %9 : vector<2x1024xf32>
    %11 = math.roundeven %10 : vector<2x1024xf32>
    %cst_4 = arith.constant 7.49989986 : f32
    %12 = arith.divf %7, %cst_4 : f32
    %13 = vector.broadcast %12 : f32 to vector<2x1024xf32>
    %14 = arith.mulf %11, %13 : vector<2x1024xf32>
    %cst_5 = arith.constant 0.000000e+00 : f32
    %15 = arith.cmpf oeq, %5, %cst_5 : f32
    %16 = arith.select %15, %0, %14 : vector<2x1024xf32>
    %c0_6 = arith.constant 0 : index
    %c0_7 = arith.constant 0 : index
    %17 = vector.load %arg1[%c0_6, %c0_7] : memref<2x1024xf32, #tpu.memory_space<vmem>>, vector<2x1024xf32>
    tpu.vector_store %arg1[%c0_6, %c0_7], %16 {strides = array<i32>} : memref<2x1024xf32, #tpu.memory_space<vmem>>, vector<2x1024xf32>,
    return
  }
}

</mosaic_0001>

<bundles_post_ra>
// kernel: tpu_custom_call.1
= control target key start
LH: loop header
LB: loop body
LE: loop exit
PB: predicated region body
PF: predicated region fallthrough
CT: control target
= control target key end

     0   :  { %6 = vsyncpa [#allocation3], 0  ;;  %s247_s0 = inlined_call_operand.hbm [shape: f32[2,1024], index: 0, kind: input, shape index: {}]   ;;  %s248_s1 = inlined_call_operand.hbm [shape: f32[2,1024], index: 1, kind: output, shape index: {}]  }
   0x1   :  { %7 = vsyncpa [#allocation4], 0  ;;  %s192_s6 = smov [#allocation2]   ;;  %s144_s10 = scalar_lea.hbm %s247_s0, 256 }
   0x2   :  { %s14_s7 = sshll.u32 %s192_s6, 4  ;;  %p145_p0 = scmp.ne.s32.totalorder %s247_s0, %s144_s10  ;;  %s15_s7 = int_to_ptr.vmem [resolvable:$true] %s14_s7 }
   0x3   :  { %p148_p1 = scmp.lt.u32.totalorder %s144_s10, %s247_s0 }
   0x5   :  { %p150_p2 = pnand %p148_p1, %p145_p0 }
   0x7   :  { %153 = shalt.err (!%p150_p2)
}
   0x8   :  { %s154_s15 = scalar_lea.vmem %s15_s7, 256  ;;  %p159_p4 = scmp.lt.s32.totalorder %s15_s7, %s15_s7 }
   0x9   :  { %p155_p3 = scmp.ne.s32.totalorder %s15_s7, %s154_s15  ;;  %p160_p5 = scmp.lt.s32.totalorder %s154_s15, %s154_s15 }
   0xb   :  { %p161_p6 = por %p160_p5, %p159_p4 }
   0xd   :  { %p162_p7 = pnand %p161_p6, %p155_p3 }
   0xf   :  { %165 = shalt.err (!%p162_p7)
}
  0x10   :  { %17 = dma.hbm_to_vmem [thread:$0]  %s247_s0, 256, %s15_s7, [#allocation3]  }
  0x11   :  { %188 = dma.done.wait [#allocation3], 256  }
  0x12   :  { %189 = vsyncadd [#allocation3], 4294967040  ;;  %v31_v0 = vlaneseq  ;;  %v193_v1 = vmov 1983009808   ;;  %v217_v6 = vld [vmem:[#allocation2] sm:$0xff]  ;;  %v219_v7 = vld [vmem:[#allocation2 + $0x8] sm:$0xff] }
  0x13   :  { %v29_v2 = vunpack.c.l.s4 %v193_v1  ;;  %v23_v8 = vand.u32 2147483647, %v217_v6  ;;  %v24_v9 = vand.u32 2147483647, %v219_v7  ;;  %vm69_vm0 = vcmask 1041408   ;;  %s194_s22 = smov [#allocation5]  }
  0x14   :  { %v32_v3 = vshrl.u32 %v31_v0, 7  ;;  %s124_s23 = sshll.u32 %s194_s22, 4  ;;  %s125_s23 = int_to_ptr.vmem [resolvable:$true] %s124_s23 }
  0x15   :  { %v30_v4 = vunpack.c.0.s8 %v29_v2  ;;  %v27_v10 = vcombine.high %v23_v8, %v23_v8  ;;  %v44_v12 = vcombine.high %v24_v9, %v24_v9  ;;  %s166_s24 = scalar_lea.vmem %s125_s23, 256  ;;  %p171_p10 = scmp.lt.s32.totalorder %s125_s23, %s125_s23 }
  0x16   :  { %p167_p9 = scmp.ne.s32.totalorder %s125_s23, %s166_s24  ;;  %p172_p11 = scmp.lt.s32.totalorder %s166_s24, %s166_s24 }
  0x17   :  { %v33_v5 = vsub.s32 %v30_v4, %v32_v3 }
  0x18   :  { %p173_p12 = por %p172_p11, %p171_p10 }
  0x19   :  { %v34_v11 = vrot.slane %v23_v8, %v33_v5  ;;  %v51_v13 = vrot.slane %v24_v9, %v33_v5  ;;  %v41_v14 = vrot.slane %v27_v10, %v33_v5  ;;  %v58_v16 = vrot.slane %v44_v12, %v33_v5 }
  0x1a   :  { %p174_p13 = pnand %p173_p12, %p167_p9 }
  0x1b   :  { %v42_v15 = vcombine.high %v34_v11, %v34_v11  ;;  %v59_v17 = vcombine.high %v51_v13, %v51_v13  ;;  %v70_v18 = vsel %vm69_vm0, %v34_v11, -inf  ;;  %v74_v19 = vsel %vm69_vm0, %v51_v13, -inf }
  0x1c   :  { %v43_v20 = vcombine.high %v41_v14, %v41_v14  ;;  %v60_v21 = vcombine.high %v58_v16, %v58_v16  ;;  %v72_v23 = vsel %vm69_vm0, %v41_v14, -inf  ;;  %v75_v24 = vmax.f32 %v70_v18, %v74_v19 }
  0x1d   :  { %v71_v22 = vsel %vm69_vm0, %v42_v15, -inf  ;;  %v76_v25 = vsel %vm69_vm0, %v59_v17, -inf  ;;  %v78_v26 = vsel %vm69_vm0, %v58_v16, -inf }
  0x1e   :  { %v73_v27 = vsel %vm69_vm0, %v43_v20, -inf  ;;  %v77_v28 = vmax.f32 %v71_v22, %v76_v25  ;;  %v79_v29 = vmax.f32 %v72_v23, %v78_v26  ;;  %v80_v30 = vsel %vm69_vm0, %v60_v21, -inf }
  0x1f   :  { %v81_v31 = vmax.f32 %v73_v27, %v80_v30 }
  0x20   :  { %v82_v32 = vmax.f32 %v75_v24, %v77_v28 }
  0x21   :  { %v83_v33 = vmax.f32 %v79_v29, %v81_v31 }
  0x23   :  { %v84_v34 = vmax.f32 %v82_v32, %v83_v33 }
  0x25   :  { %85 = vmax.xlane.f32.xlu0 %v84_v34 }
  0xb2   :  { %v86_v35 = vpop.xlane.xlu0 %85 }
  0xb3   :  { %v87_v36 = vrot.slane %v86_v35, 4 }
  0xb5   :  { %v88_v37 = vmax.f32 %v86_v35, %v87_v36 }
  0xb7   :  { %v89_v38 = vrot.slane %v88_v37, 2 }
  0xb9   :  { %v90_v39 = vmax.f32 %v88_v37, %v89_v38 }
  0xbb   :  { %v91_v40 = vrot.slane %v90_v39, 1 }
  0xbd   :  { %v92_v41 = vmax.f32 %v90_v39, %v91_v40 }
  0xbf   :  { %133 = vpush %v92_v41 }
  0xf0   :  { %s134_s0 = spop %133 }
  0xf1   :  { %p94_p8 = scmp.eq.f32.partialorder %s134_s0, 0.0 }
  0xf3   :  { %s250_s0 = smov (%p94_p8, %s134_s0), 1.0 }
  0xf4   :  { %v96_v42 = vstv %s250_s0  ;;  %s111_s20 = scalar_select %p94_p8, 1, 0 }
  0xf5   :  { %142 = vrcp.f32 %v96_v42  ;;  %s107_s21 = smul.f32 0.13333511, %s250_s0 }
  0xf6   :  { %v112_v47 = vstv %s111_s20 }
  0xf7   :  { %v108_v50 = vstv %s107_s21  ;;  %vm113_vm1 = vcmp.eq.s32.totalorder %v112_v47, 1 }
  0xff   :  { %v143_v43 = vpop.eup %142 }
 0x100   :  { %135 = vpush %v143_v43 }
 0x131   :  { %s136_s18 = spop %135 }
 0x132   :  { %s99_s19 = smul.f32 7.4999, %s136_s18 }
 0x134   :  { %v100_v44 = vstv %s99_s19 }
 0x135   :  { %v101_v45 = vmul.f32 %v100_v44, %v217_v6  ;;  %v102_v46 = vmul.f32 %v100_v44, %v219_v7 }
 0x137   :  { %v137_v48 = vround.rtne.f32 %v101_v45  ;;  %v138_v49 = vround.rtne.f32 %v102_v46 }
 0x139   :  { %v109_v51 = vmul.f32 %v137_v48, %v108_v50  ;;  %v110_v52 = vmul.f32 %v138_v49, %v108_v50 }
 0x13b   :  { %v114_v53 = vsel %vm113_vm1, %v217_v6, %v109_v51  ;;  %v115_v54 = vsel %vm113_vm1, %v219_v7, %v110_v52 }
 0x13c   :  { %116 = vst [vmem:[#allocation5] sm:$0xff] %v114_v53  ;;  %117 = vst [vmem:[#allocation5 + $0x8] sm:$0xff] %v115_v54 }
 0x13d   :  { %177 = shalt.err (!%p174_p13)
}
 0x13e   :  { %s178_s27 = scalar_lea.hbm %s248_s1, 256 }
 0x13f   :  { %p179_p0 = scmp.ne.s32.totalorder %s248_s1, %s178_s27  ;;  %p182_p1 = scmp.lt.u32.totalorder %s178_s27, %s248_s1 }
 0x141   :  { %p184_p2 = pnand %p182_p1, %p179_p0 }
 0x143   :  { %187 = shalt.err (!%p184_p2)
}
 0x144   :  { %127 = dma.vmem_to_hbm [thread:$0]  %s125_s23, 256, %s248_s1, [#allocation4]  }
 0x145   :  { %190 = dma.done.wait [#allocation4], 256  }
 0x146   :  { %191 = vsyncadd [#allocation4], 4294967040 }
 0x147   :  { %131 = vsyncpa [#allocation3], 1 }
 0x148   :  { %132 = vsyncpa [#allocation4], 1 }

</bundles_post_ra>
